<compile_context>
chip_gen: v7x
topology: tpu7x:2x2x1
jax: 0.10.0
libtpu: 0.0.40
codegen_flags: <defaults>
</compile_context>

<pallas_src>
import jax
import jax.numpy as jnp
from jax.experimental import pallas as pl
from jax.experimental.pallas import tpu as pltpu

_NEG_LARGE = -1e30   # finite "-inf" for padded class columns
_N_PAD = 128         # class dim padded to one full lane width


def _round_up(x, m):
    return (x + m - 1) // m * m


def _nsp_kernel(x_ref, w_ref, b_ref, o_ref):
    # x_ref: (tm, Hp) bf16   w_ref: (Hp, Np) bf16   b_ref: (1, Np) f32
    # o_ref: (tm, Np) f32
    # 1) Linear: logits = x @ W + b   (bf16 MXU operands, f32 accumulation)
    logits = jnp.dot(x_ref[...], w_ref[...],
                     preferred_element_type=jnp.float32) + b_ref[...]
    # 2) Numerically stable LogSoftmax over the (padded) class axis, in f32.
    m = jnp.max(logits, axis=-1, keepdims=True)
    shifted = logits - m
    lse = jnp.log(jnp.sum(jnp.exp(shifted), axis=-1, keepdims=True))
    o_ref[...] = (shifted - lse).astype(o_ref.dtype)


def next_sentence_prediction(x, weight, bias, *, tm_max=256):
    """x: (B, S, H); weight: (2, H) (PyTorch layout); bias: (2,) -> (B, 2) log-probs."""
    B, S, H = x.shape
    C, H_w = weight.shape
    assert H_w == H and bias.shape == (C,)

    # --- wrapper-side layout prep -------------------------------------------
    cls = x[:, 0, :].astype(jnp.float32)            # (B, H): only the [CLS] token
    Hp = _round_up(H, 128)                          # lane/MXU-aligned contraction dim
    tm = min(tm_max, _round_up(max(B, 1), 8))       # adaptive row tile, >= 8
    Mp = _round_up(B, tm)                           # pad rows instead of asserting

    x2d = jnp.zeros((Mp, Hp), jnp.float32).at[:B, :H].set(cls).astype(jnp.bfloat16)
    w2d = jnp.zeros((Hp, _N_PAD), jnp.float32).at[:H, :C].set(
        weight.astype(jnp.float32).T).astype(jnp.bfloat16)
    b2d = jnp.full((1, _N_PAD), _NEG_LARGE, jnp.float32).at[0, :C].set(
        bias.astype(jnp.float32))

    # Rough double-buffered VMEM footprint + headroom (kept well under the
    # 32 MiB scoped default and v7x's 64 MiB physical VMEM).
    vmem_bytes = (2 * tm * Hp * 2            # x tiles (bf16)
                  + 2 * Hp * _N_PAD * 2      # resident weight (bf16)
                  + 2 * _N_PAD * 4           # bias (f32)
                  + 2 * tm * _N_PAD * 4)     # output tiles (f32)
    vmem_limit = min(max(vmem_bytes + (4 << 20), 8 << 20), 32 << 20)

    out = pl.pallas_call(
        _nsp_kernel,
        out_shape=jax.ShapeDtypeStruct((Mp, _N_PAD), jnp.float32),
        grid_spec=pltpu.PrefetchScalarGridSpec(
            num_scalar_prefetch=0,
            grid=(Mp // tm,),
            in_specs=[
                pl.BlockSpec((tm, Hp), lambda i: (i, 0)),      # [CLS] row tile
                pl.BlockSpec((Hp, _N_PAD), lambda i: (0, 0)),  # resident weight
                pl.BlockSpec((1, _N_PAD), lambda i: (0, 0)),   # resident bias
            ],
            out_specs=pl.BlockSpec((tm, _N_PAD), lambda i: (i, 0)),
        ),
        compiler_params=pltpu.CompilerParams(
            dimension_semantics=("parallel",),   # row axis shards across TCs (v7x)
            vmem_limit_bytes=vmem_limit),
    )(x2d, w2d, b2d)

    return out[:B, :C]


if __name__ == "__main__":
    # Small shapes consistent with the module's forward:
    # (batch, seq, hidden) -> take [CLS] -> (batch, 2) log-probs.
    batch, seq, hidden = 2, 8, 32

    key = jax.random.PRNGKey(0)
    kx, kw, kb = jax.random.split(key, 3)

    x = jax.random.normal(kx, (batch, seq, hidden), dtype=jnp.float32)
    # Deterministic "Linear(hidden, 2)" params (PyTorch-style uniform init).
    bound = 1.0 / (hidden ** 0.5)
    weight = jax.random.uniform(kw, (2, hidden), minval=-bound,
                                maxval=bound, dtype=jnp.float32)
    bias = jax.random.uniform(kb, (2,), minval=-bound,
                              maxval=bound, dtype=jnp.float32)

    out = next_sentence_prediction(x, weight, bias)
    out = jax.block_until_ready(out)

    # Reference check in plain JAX (f32); bf16 MXU operands -> loosened tol.
    ref = jax.nn.log_softmax(x[:, 0, :] @ weight.T + bias, axis=-1)
    assert out.shape == (batch, 2)
    assert jnp.allclose(out, ref, atol=1e-2, rtol=1e-2)

    print("KERNEL_OK")
</pallas_src>

<mosaic_0001>
module attributes {stable_mosaic.version = 11 : i64} {
  func.func @_nsp_kernel(%arg0: i32, %arg1: memref<8x128xbf16, #tpu.memory_space<vmem>>, %arg2: memref<128x128xbf16, #tpu.memory_space<vmem>>, %arg3: memref<1x128xf32, #tpu.memory_space<vmem>>, %arg4: memref<8x128xf32, #tpu.memory_space<vmem>>) attributes {dimension_semantics = [#tpu.dimension_semantics<parallel>], iteration_bounds = array<i64: 1>, scalar_prefetch = 0 : i64, scratch_operands = 0 : i64, tpu.core_type = #tpu.core_type<tc>, window_params = [{transform_indices = @transform_0, window_bounds = array<i64: 8, 128>}, {pipeline_mode = #tpu.pipeline_mode<synchronous>, transform_indices = @transform_1, window_bounds = array<i64: 128, 128>}, {pipeline_mode = #tpu.pipeline_mode<synchronous>, transform_indices = @transform_2, window_bounds = array<i64: 1, 128>}, {transform_indices = @transform_3, window_bounds = array<i64: 8, 128>}]} {
    %c0 = arith.constant 0 : index
    %c0_0 = arith.constant 0 : index
    %0 = vector.load %arg1[%c0, %c0_0] : memref<8x128xbf16, #tpu.memory_space<vmem>>, vector<8x128xbf16>
    %c0_1 = arith.constant 0 : index
    %c0_2 = arith.constant 0 : index
    %1 = vector.load %arg2[%c0_1, %c0_2] : memref<128x128xbf16, #tpu.memory_space<vmem>>, vector<128x128xbf16>
    %cst = arith.constant dense<0.000000e+00> : vector<8x128xf32>
    %2 = tpu.matmul %0, %1, %cst {dimension_numbers = #tpu.dot_dimension_numbers<[1], [0], [0], [1], [0, 0, 1, 1], [], []>} : vector<8x128xbf16>, vector<128x128xbf16>, vector<8x128xf32> -> vector<8x128xf32>
    %c0_3 = arith.constant 0 : index
    %c0_4 = arith.constant 0 : index
    %3 = vector.load %arg3[%c0_3, %c0_4] : memref<1x128xf32, #tpu.memory_space<vmem>>, vector<1x128xf32>
    %4 = vector.broadcast %3 : vector<1x128xf32> to vector<8x128xf32>
    %5 = arith.addf %2, %4 : vector<8x128xf32>
    %cst_5 = arith.constant dense<0xFF800000> : vector<8xf32>
    %6 = vector.multi_reduction <maximumf>, %5, %cst_5 [1] : vector<8x128xf32> to vector<8xf32>
    %7 = vector.shape_cast %6 : vector<8xf32> to vector<8x1xf32>
    %8 = vector.broadcast %7 : vector<8x1xf32> to vector<8x128xf32>
    %9 = arith.subf %5, %8 : vector<8x128xf32>
    %10 = math.exp %9 : vector<8x128xf32>
    %cst_6 = arith.constant dense<0.000000e+00> : vector<8xf32>
    %11 = vector.multi_reduction <add>, %10, %cst_6 [1] : vector<8x128xf32> to vector<8xf32>
    %12 = vector.shape_cast %11 : vector<8xf32> to vector<8x1xf32>
    %13 = math.log %12 : vector<8x1xf32>
    %14 = vector.broadcast %13 : vector<8x1xf32> to vector<8x128xf32>
    %15 = arith.subf %9, %14 : vector<8x128xf32>
    %c0_7 = arith.constant 0 : index
    %c0_8 = arith.constant 0 : index
    %16 = vector.load %arg4[%c0_7, %c0_8] : memref<8x128xf32, #tpu.memory_space<vmem>>, vector<8x128xf32>
    tpu.vector_store %arg4[%c0_7, %c0_8], %15 {strides = array<i32>} : memref<8x128xf32, #tpu.memory_space<vmem>>, vector<8x128xf32>,
    return
  }
  func.func @transform_0(%arg0: i32) -> (i32, i32) {
    %c0_i32 = arith.constant 0 : i32
    %c0_i32_0 = arith.constant 0 : i32
    return %arg0, %c0_i32 : i32, i32
  }
  func.func @transform_1(%arg0: i32) -> (i32, i32) {
    %c0_i32 = arith.constant 0 : i32
    %c0_i32_0 = arith.constant 0 : i32
    %c0_i32_1 = arith.constant 0 : i32
    return %c0_i32, %c0_i32_0 : i32, i32
  }
  func.func @transform_2(%arg0: i32) -> (i32, i32) {
    %c0_i32 = arith.constant 0 : i32
    %c0_i32_0 = arith.constant 0 : i32
    %c0_i32_1 = arith.constant 0 : i32
    return %c0_i32, %c0_i32_0 : i32, i32
  }
  func.func @transform_3(%arg0: i32) -> (i32, i32) {
    %c0_i32 = arith.constant 0 : i32
    %c0_i32_0 = arith.constant 0 : i32
    return %arg0, %c0_i32 : i32, i32
  }
}

</mosaic_0001>

<bundles_post_ra>
// kernel: tpu_custom_call.1
= control target key start
LH: loop header
LB: loop body
LE: loop exit
PB: predicated region body
PF: predicated region fallthrough
CT: control target
= control target key end

     0   :  { %8 = vsyncpa [#allocation3], 0  ;;  %s383_s0 = inlined_call_operand.hbm [shape: bf16[8,128], index: 0, kind: input, shape index: {}]   ;;  %s384_s1 = inlined_call_operand.hbm [shape: bf16[128,128], index: 1, kind: input, shape index: {}]   ;;  %s385_s2 = inlined_call_operand.vmem [shape: f32[1,128], index: 2, kind: input, shape index: {}]   ;;  %s386_s3 = inlined_call_operand.hbm [shape: f32[8,128], index: 3, kind: output, shape index: {}]  }
   0x1   :  { %9 = vsyncpa [#allocation6], 0 }
   0x2   :  { %10 = vsyncpa [#allocation4], 0  ;;  %s310_s12 = smov [#allocation2]   ;;  %s311_s14 = smov [#allocation5]  }
   0x3   :  { %s17_s13 = sshll.u32 %s310_s12, 4  ;;  %s26_s15 = sshll.u32 %s311_s14, 4  ;;  %s18_s13 = int_to_ptr.vmem [resolvable:$true] %s17_s13  ;;  %s337_s15 = int_to_ptr.vmem [resolvable:$true] %s26_s15 }
   0x4   :  { %s238_s18 = scalar_lea.hbm %s383_s0, 64 }
   0x5   :  { %p239_p0 = scmp.ne.s32.totalorder %s383_s0, %s238_s18  ;;  %p242_p1 = scmp.lt.u32.totalorder %s238_s18, %s383_s0 }
   0x7   :  { %p244_p2 = pnand %p242_p1, %p239_p0 }
   0x9   :  { %247 = shalt.err (!%p244_p2)
}
   0xa   :  { %s248_s23 = scalar_lea.vmem %s18_s13, 64  ;;  %p253_p4 = scmp.lt.s32.totalorder %s18_s13, %s18_s13 }
   0xb   :  { %p249_p3 = scmp.ne.s32.totalorder %s18_s13, %s248_s23  ;;  %p254_p5 = scmp.lt.s32.totalorder %s248_s23, %s248_s23 }
   0xd   :  { %p255_p6 = por %p254_p5, %p253_p4 }
   0xf   :  { %p256_p7 = pnand %p255_p6, %p249_p3 }
  0x11   :  { %259 = shalt.err (!%p256_p7)
}
  0x12   :  { %20 = dma.hbm_to_vmem [thread:$0]  %s383_s0, 64, %s18_s13, [#allocation3]  }
  0x13   :  { %s260_s28 = scalar_lea.hbm %s384_s1, 1024 }
  0x14   :  { %p261_p8 = scmp.ne.s32.totalorder %s384_s1, %s260_s28  ;;  %p264_p9 = scmp.lt.u32.totalorder %s260_s28, %s384_s1 }
  0x16   :  { %p266_p10 = pnand %p264_p9, %p261_p8 }
  0x18   :  { %269 = shalt.err (!%p266_p10)
}
  0x19   :  { %s270_s6 = scalar_lea.vmem %s337_s15, 1024  ;;  %p275_p12 = scmp.lt.s32.totalorder %s337_s15, %s337_s15 }
  0x1a   :  { %p271_p11 = scmp.ne.s32.totalorder %s337_s15, %s270_s6  ;;  %p276_p13 = scmp.lt.s32.totalorder %s270_s6, %s270_s6 }
  0x1c   :  { %p277_p0 = por %p276_p13, %p275_p12 }
  0x1e   :  { %p278_p1 = pnand %p277_p0, %p271_p11 }
  0x20   :  { %281 = shalt.err (!%p278_p1)
}
  0x21   :  { %s312_s0 = smov 64   ;;  %s313_s7 = smov 4  }
  0x22   :  { %32 = dma.hbm_to_vmem [thread:$0]  %s384_s1, 1024, %s337_s15, [#allocation6], %s312_s0, %s312_s0, %s313_s7  }
  0x23   :  { %304 = dma.done.wait [#allocation3], 64  }
  0x24   :  { %305 = vsyncadd [#allocation3], 4294967232 }
  0x25   :  { %306 = dma.done.wait [#allocation6], 1024  }
  0x26   :  { %307 = vsyncadd [#allocation6], 4294966272  ;;  %v314_v0 = vmov 0.0   ;;  %vm315_vm0 = vmmov 0   ;;  %v226_v1 = vld [vmem:[#allocation5] sm:$0xff]   ;;  %v227_v2 = vld [vmem:[#allocation5 + $0x8] sm:$0xff]  }
  0x27   :  { %199 = vmatprep.subr.bf16.mxu0 %v314_v0  ;;  %215 = vmatprep.mubr.msk.bf16.mxu0 %vm315_vm0, %v314_v0  ;;  %v228_v3 = vld [vmem:[#allocation5 + $0x10] sm:$0xff]   ;;  %v229_v4 = vld [vmem:[#allocation5 + $0x18] sm:$0xff]   ;;  %v230_v5 = vld [vmem:[#allocation5 + $0x20] sm:$0xff]   ;;  %s316_s11 = smov [#allocation7]  }
  0x28   :  { %200 = vmatpush3.bf16.msra.mxu0 %v226_v1  ;;  %v231_v6 = vld [vmem:[#allocation5 + $0x28] sm:$0xff]   ;;  %v232_v7 = vld [vmem:[#allocation5 + $0x30] sm:$0xff]   ;;  %v233_v8 = vld [vmem:[#allocation5 + $0x38] sm:$0xff]   ;;  %s171_s12 = sshll.u32 %s316_s11, 4  ;;  %s172_s12 = int_to_ptr.vmem [resolvable:$true] %s171_s12 }
  0x29   :  { %201 = vmatprep.subr.bf16.mxu0 %v314_v0  ;;  %v42_v9 = vld [vmem:[#allocation2] sm:$0xf]  ;;  %p287_p3 = scmp.lt.s32.totalorder %s172_s12, %s172_s12 }
  0x2a   :  { %v181_v10 = vld [vmem:[%s385_s2] ss:$0 sm:$0xff]  ;;  %s282_s2 = scalar_lea.vmem %s172_s12, 128 }
  0x2b   :  { %p283_p2 = scmp.ne.s32.totalorder %s172_s12, %s282_s2  ;;  %p288_p4 = scmp.lt.s32.totalorder %s282_s2, %s282_s2 }
  0x2c   :  { %202 = vmatpush3.bf16.msra.mxu0 %v227_v2 }
  0x2d   :  { %203 = vmatprep.subr.bf16.mxu0 %v314_v0  ;;  %p289_p5 = por %p288_p4, %p287_p3 }
  0x2f   :  { %p290_p6 = pnand %p289_p5, %p283_p2 }
  0x30   :  { %204 = vmatpush3.bf16.msra.mxu0 %v228_v3 }
  0x31   :  { %205 = vmatprep.subr.bf16.mxu0 %v314_v0 }
  0x34   :  { %206 = vmatpush3.bf16.msra.mxu0 %v229_v4 }
  0x35   :  { %207 = vmatprep.subr.bf16.mxu0 %v314_v0 }
  0x38   :  { %208 = vmatpush3.bf16.msra.mxu0 %v230_v5 }
  0x39   :  { %209 = vmatprep.subr.bf16.mxu0 %v314_v0 }
  0x3c   :  { %210 = vmatpush3.bf16.msra.mxu0 %v231_v6 }
  0x3d   :  { %211 = vmatprep.subr.bf16.mxu0 %v314_v0 }
  0x40   :  { %212 = vmatpush3.bf16.msra.mxu0 %v232_v7 }
  0x41   :  { %213 = vmatprep.subr.bf16.mxu0 %v314_v0 }
  0x44   :  { %214 = vmatpush3.bf16.msra.mxu0 %v233_v8 }
  0x47   :  { %216 = vmatmul.mubr.bf16.vlgmr.msra.gmra.mrb[0].mxu0 %v42_v9 }
 0x11a   :  { %v148_v11 = vpop.f32.mrb[0].mxu0 }
 0x11b   :  { %v149_v12 = vadd.f32 %v181_v10, %v148_v11  ;;  %v217_v13 = vpop.f32.mrb[1].mxu0 }
 0x11c   :  { %v151_v14 = vpop.f32.mrb[2].mxu0 }
 0x11d   :  { %154 = vmax.xlane.f32.xlu0 %v149_v12  ;;  %v218_v15 = vpop.f32.mrb[3].mxu0 }
 0x1aa   :  { %v155_v16 = vpop.xlane.xlu0 %154 }
 0x1ab   :  { %v156_v17 = vsub.f32 %v149_v12, %v155_v16 }
 0x1ad   :  { %v157_v18 = vmul.f32 1.442695, %v156_v17 }
 0x1af   :  { %234 = vpow2.f32 %v157_v18 }
 0x1b9   :  { %v235_v19 = vpop.eup %234 }
 0x1ba   :  { %159 = vadd.xlane.f32.xlu0 %v235_v19 }
 0x247   :  { %v160_v20 = vpop.xlane.xlu0 %159 }
 0x248   :  { %236 = vlog2.f32 %v160_v20 }
 0x252   :  { %v237_v21 = vpop.eup %236 }
 0x253   :  { %v162_v22 = vmul.f32 0.6931472, %v237_v21 }
 0x255   :  { %v163_v23 = vsub.f32 %v156_v17, %v162_v22 }
 0x257   :  { %164 = vst [vmem:[#allocation7] sm:$0xff] %v163_v23 }
 0x258   :  { %293 = shalt.err (!%p290_p6)
}
 0x259   :  { %s294_s15 = scalar_lea.hbm %s386_s3, 128 }
 0x25a   :  { %p295_p7 = scmp.ne.s32.totalorder %s386_s3, %s294_s15  ;;  %p298_p8 = scmp.lt.u32.totalorder %s294_s15, %s386_s3 }
 0x25c   :  { %p300_p9 = pnand %p298_p8, %p295_p7 }
 0x25e   :  { %303 = shalt.err (!%p300_p9)
}
 0x25f   :  { %174 = dma.vmem_to_hbm [thread:$0]  %s172_s12, 128, %s386_s3, [#allocation4]  }
 0x260   :  { %308 = dma.done.wait [#allocation4], 128  }
 0x261   :  { %309 = vsyncadd [#allocation4], 4294967168 }
 0x262   :  { %178 = vsyncpa [#allocation3], 1 }
 0x263   :  { %179 = vsyncpa [#allocation6], 1 }
 0x264   :  { %180 = vsyncpa [#allocation4], 1 }

</bundles_post_ra>
